<compile_context>
chip_gen: v7x
topology: tpu7x:2x2x1
jax: 0.10.0
libtpu: 0.0.40
codegen_flags: <defaults>
</compile_context>

<pallas_src>
import functools

import numpy as np
import jax
import jax.numpy as jnp
from jax import lax
from jax.experimental import pallas as pl
from jax.experimental.pallas import tpu as pltpu

# ----------------------------- config (synthetic, small) -----------------------------
HIDDEN = 32
NUM_HEADS = 4
HEAD_DIM = HIDDEN // NUM_HEADS            # 8
NUM_KV_HEADS = 2                          # multi_query_group_num
Q_SIZE = NUM_HEADS * HEAD_DIM             # 32
KV_SIZE = NUM_KV_HEADS * HEAD_DIM         # 16
QKV_SIZE = Q_SIZE + 2 * KV_SIZE           # 64
FFN = 64                                  # ffn_hidden_size
EPS = 1e-5
ROPE_BASE = 10000.0                       # base * rope_ratio(=1.0)
ROTARY_DIM = HEAD_DIM // 2                # 4
SCALE = HEAD_DIM ** -0.5
SEQ = 8


# ----------------------------- fused Pallas kernel -----------------------------
def _rms(x, w, eps):
    var = jnp.mean(x * x, axis=-1, keepdims=True)
    return (x * lax.rsqrt(var + eps)) * w


def glm_block_kernel(hidden_ref, ln1_w_ref, ln2_w_ref,
                     w_qkv_ref, b_qkv_ref,
                     rope_cos_ref, rope_sin_ref, rope_perm_ref,
                     w_o_ref, w_gate_ref, w_up_ref, w_down_ref,
                     o_ref, *,
                     eps, scale, num_heads, num_kv_heads, head_dim,
                     q_size, kv_size):
    hidden = hidden_ref[...].astype(jnp.float32)                     # [T, H]
    t = hidden.shape[0]

    # ---- input RMSNorm ----
    ln1 = _rms(hidden, ln1_w_ref[...].astype(jnp.float32), eps)

    # ---- QKV projection (+ qkv bias) ----
    qkv = jnp.dot(ln1, w_qkv_ref[...], preferred_element_type=jnp.float32)
    qkv = qkv + b_qkv_ref[...].astype(jnp.float32)                   # [T, QKV]

    # ---- RoPE (interleaved / non-neox) on q & k columns (v columns pass through):
    #      out = x * cos + (x @ P) * sin, with P the per-pair swap/sign matrix. ----
    swapped = jnp.dot(qkv, rope_perm_ref[...], preferred_element_type=jnp.float32)
    qkv = qkv * rope_cos_ref[...] + swapped * rope_sin_ref[...]

    q = qkv[:, :q_size]                                              # [T, nH*hd]
    k = qkv[:, q_size:q_size + kv_size]                              # [T, nKV*hd]
    v = qkv[:, q_size + kv_size:]                                    # [T, nKV*hd]

    # ---- causal multi-query attention; per-head ctx folded into o_proj accumulation ----
    row = lax.broadcasted_iota(jnp.int32, (t, t), 0)
    col = lax.broadcasted_iota(jnp.int32, (t, t), 1)
    causal = col <= row
    rep = num_heads // num_kv_heads
    attn_out = jnp.zeros((t, hidden.shape[1]), jnp.float32)
    for h in range(num_heads):                                       # unrolled at trace time
        g = h // rep                                                 # KV head index (no repeat)
        qh = q[:, h * head_dim:(h + 1) * head_dim]
        kh = k[:, g * head_dim:(g + 1) * head_dim]
        vh = v[:, g * head_dim:(g + 1) * head_dim]
        # contract head_dim of both operands directly (no k.T / XLU transpose)
        s = lax.dot_general(qh, kh, (((1,), (1,)), ((), ())),
                            preferred_element_type=jnp.float32) * scale
        s = jnp.where(causal, s, -1e30)
        m = jnp.max(s, axis=-1, keepdims=True)
        p = jnp.exp(s - m)
        p = p * pl.reciprocal(jnp.sum(p, axis=-1, keepdims=True), approx=True)
        ctx_h = jnp.dot(p, vh, preferred_element_type=jnp.float32)   # [T, hd]
        # o_proj (RowParallelLinear, no bias): accumulate this head's contribution.
        attn_out = attn_out + jnp.dot(
            ctx_h, w_o_ref[h * head_dim:(h + 1) * head_dim, :],
            preferred_element_type=jnp.float32)

    # ---- residual (post_layernorm=False) + post-attention RMSNorm ----
    ln_input = hidden + attn_out
    ln2 = _rms(ln_input, ln2_w_ref[...].astype(jnp.float32), eps)

    # ---- MLP: gate/up as separate lane-dense matmuls, SiluAndMul, down proj + residual ----
    gate = jnp.dot(ln2, w_gate_ref[...], preferred_element_type=jnp.float32)
    up = jnp.dot(ln2, w_up_ref[...], preferred_element_type=jnp.float32)
    act = (gate * jax.nn.sigmoid(gate)) * up
    out = jnp.dot(act, w_down_ref[...], preferred_element_type=jnp.float32) + ln_input
    o_ref[...] = out.astype(o_ref.dtype)


# ----------------------------- wrapper -----------------------------
def _full_spec(shape):
    return pl.BlockSpec(shape, lambda i: tuple(0 for _ in shape))


def _rope_tables(positions):
    """cos/sin tables over the full QKV width + pair-swap matrix for interleaved RoPE."""
    t = positions.shape[0]
    half = ROTARY_DIM // 2
    inv_freq = 1.0 / (ROPE_BASE ** (jnp.arange(half, dtype=jnp.float32) * 2.0 / ROTARY_DIM))
    freqs = positions.astype(jnp.float32)[:, None] * inv_freq[None, :]          # [T, half]
    cos = jnp.repeat(jnp.cos(freqs), 2, axis=1)                                 # [T, rotary]
    sin = jnp.repeat(jnp.sin(freqs), 2, axis=1)
    pass_dim = HEAD_DIM - ROTARY_DIM
    cos_hd = jnp.concatenate([cos, jnp.ones((t, pass_dim), jnp.float32)], axis=1)   # [T, hd]
    sin_hd = jnp.concatenate([sin, jnp.zeros((t, pass_dim), jnp.float32)], axis=1)
    n_roped = NUM_HEADS + NUM_KV_HEADS            # q heads + k heads get RoPE; v passes through
    cos_full = jnp.concatenate([jnp.tile(cos_hd, (1, n_roped)),
                                jnp.ones((t, KV_SIZE), jnp.float32)], axis=1)   # [T, QKV]
    sin_full = jnp.concatenate([jnp.tile(sin_hd, (1, n_roped)),
                                jnp.zeros((t, KV_SIZE), jnp.float32)], axis=1)  # [T, QKV]
    # (x @ P)[2i] = -x[2i+1], (x @ P)[2i+1] = x[2i] inside each roped head's rotary dims.
    perm = np.zeros((QKV_SIZE, QKV_SIZE), np.float32)
    for h in range(n_roped):
        off = h * HEAD_DIM
        for i in range(ROTARY_DIM // 2):
            perm[off + 2 * i + 1, off + 2 * i] = -1.0
            perm[off + 2 * i, off + 2 * i + 1] = 1.0
    return cos_full, sin_full, jnp.asarray(perm)


@jax.jit
def glm_block_forward(hidden_states, position_ids, params):
    t, h = hidden_states.shape
    cos_full, sin_full, perm_full = _rope_tables(position_ids)
    w_gate = params["w_h_to_4h"][:, :FFN]
    w_up = params["w_h_to_4h"][:, FFN:]

    kernel = functools.partial(
        glm_block_kernel, eps=EPS, scale=SCALE,
        num_heads=NUM_HEADS, num_kv_heads=NUM_KV_HEADS, head_dim=HEAD_DIM,
        q_size=Q_SIZE, kv_size=KV_SIZE)

    in_arrays = [
        hidden_states,
        params["input_ln_w"].reshape(1, h),
        params["post_ln_w"].reshape(1, h),
        params["w_qkv"],
        params["b_qkv"].reshape(1, QKV_SIZE),
        cos_full, sin_full, perm_full,
        params["w_o"], w_gate, w_up, params["w_4h_to_h"],
    ]
    return pl.pallas_call(
        kernel,
        out_shape=jax.ShapeDtypeStruct((t, h), hidden_states.dtype),
        grid=(1,),
        in_specs=[_full_spec(a.shape) for a in in_arrays],
        out_specs=_full_spec((t, h)),
        compiler_params=pltpu.CompilerParams(dimension_semantics=("arbitrary",)),
    )(*in_arrays)


# ----------------------------- pure-JAX reference (for sanity check) -----------------------------
def _apply_rope_ref(x, positions):
    # x: [T, n_heads, head_dim]; rotate first ROTARY_DIM dims, interleaved pairs.
    half = ROTARY_DIM // 2
    inv_freq = 1.0 / (ROPE_BASE ** (jnp.arange(0, half, dtype=jnp.float32) * 2.0 / ROTARY_DIM))
    freqs = positions.astype(jnp.float32)[:, None] * inv_freq[None, :]
    cos = jnp.cos(freqs)[:, None, :]
    sin = jnp.sin(freqs)[:, None, :]
    x_rot = x[..., :ROTARY_DIM].astype(jnp.float32)
    x_pass = x[..., ROTARY_DIM:]
    x1 = x_rot[..., 0::2]
    x2 = x_rot[..., 1::2]
    o1 = x1 * cos - x2 * sin
    o2 = x2 * cos + x1 * sin
    out_rot = jnp.stack([o1, o2], axis=-1).reshape(x_rot.shape).astype(x.dtype)
    return jnp.concatenate([out_rot, x_pass], axis=-1)


def _rms_ref(x, w):
    xf = x.astype(jnp.float32)
    return (xf * lax.rsqrt(jnp.mean(xf * xf, -1, keepdims=True) + EPS)) * w


def glm_block_ref(hidden_states, position_ids, params):
    t, h = hidden_states.shape
    ln_out = _rms_ref(hidden_states, params["input_ln_w"])
    qkv = ln_out @ params["w_qkv"] + params["b_qkv"]
    q = qkv[:, :Q_SIZE].reshape(t, NUM_HEADS, HEAD_DIM)
    k = qkv[:, Q_SIZE:Q_SIZE + KV_SIZE].reshape(t, NUM_KV_HEADS, HEAD_DIM)
    v = qkv[:, Q_SIZE + KV_SIZE:].reshape(t, NUM_KV_HEADS, HEAD_DIM)
    q = _apply_rope_ref(q, position_ids)
    k = _apply_rope_ref(k, position_ids)
    rep = NUM_HEADS // NUM_KV_HEADS
    k = jnp.repeat(k, rep, axis=1)
    v = jnp.repeat(v, rep, axis=1)
    s = jnp.einsum("tnd,snd->nts", q, k) * SCALE
    row = jnp.arange(t)[:, None]
    col = jnp.arange(t)[None, :]
    s = jnp.where(col <= row, s, -1e30)
    p = jax.nn.softmax(s, axis=-1)
    ctx = jnp.einsum("nts,snd->tnd", p, v).reshape(t, NUM_HEADS * HEAD_DIM)
    attn_out = ctx @ params["w_o"]
    ln_input = hidden_states + attn_out
    ln2_out = _rms_ref(ln_input, params["post_ln_w"])
    hh = ln2_out @ params["w_h_to_4h"]
    gate, up = hh[:, :FFN], hh[:, FFN:]
    act = gate * jax.nn.sigmoid(gate) * up
    return act @ params["w_4h_to_h"] + ln_input


# ----------------------------- main -----------------------------
if __name__ == "__main__":
    key = jax.random.PRNGKey(0)
    ks = jax.random.split(key, 8)

    params = {
        "input_ln_w": jnp.ones((HIDDEN,), jnp.float32)
                      + 0.01 * jax.random.normal(ks[0], (HIDDEN,), jnp.float32),
        "post_ln_w": jnp.ones((HIDDEN,), jnp.float32)
                     + 0.01 * jax.random.normal(ks[1], (HIDDEN,), jnp.float32),
        "w_qkv": 0.02 * jax.random.normal(ks[2], (HIDDEN, QKV_SIZE), jnp.float32),
        "b_qkv": 0.02 * jax.random.normal(ks[3], (QKV_SIZE,), jnp.float32),
        "w_o": 0.02 * jax.random.normal(ks[4], (NUM_HEADS * HEAD_DIM, HIDDEN), jnp.float32),
        "w_h_to_4h": 0.02 * jax.random.normal(ks[5], (HIDDEN, 2 * FFN), jnp.float32),
        "w_4h_to_h": 0.02 * jax.random.normal(ks[6], (FFN, HIDDEN), jnp.float32),
    }

    hidden_states = jax.random.normal(ks[7], (SEQ, HIDDEN), jnp.float32)
    position_ids = jnp.arange(SEQ, dtype=jnp.int32)

    out = jax.block_until_ready(glm_block_forward(hidden_states, position_ids, params))
    ref = jax.block_until_ready(glm_block_ref(hidden_states, position_ids, params))

    assert out.shape == (SEQ, HIDDEN)
    # atol slack covers the EUP approximate-reciprocal softmax normalization.
    assert jnp.allclose(out, ref, rtol=1e-4, atol=5e-4), "Pallas output mismatch vs reference"

    print("KERNEL_OK")
</pallas_src>

<mosaic_0001>
module attributes {stable_mosaic.version = 11 : i64} {
  func.func @glm_block_kernel(%arg0: i32, %arg1: memref<8x32xf32, #tpu.memory_space<vmem>>, %arg2: memref<1x32xf32, #tpu.memory_space<vmem>>, %arg3: memref<1x32xf32, #tpu.memory_space<vmem>>, %arg4: memref<32x64xf32, #tpu.memory_space<vmem>>, %arg5: memref<1x64xf32, #tpu.memory_space<vmem>>, %arg6: memref<8x64xf32, #tpu.memory_space<vmem>>, %arg7: memref<8x64xf32, #tpu.memory_space<vmem>>, %arg8: memref<64x64xf32, #tpu.memory_space<vmem>>, %arg9: memref<32x32xf32, #tpu.memory_space<vmem>>, %arg10: memref<32x64xf32, #tpu.memory_space<vmem>>, %arg11: memref<32x64xf32, #tpu.memory_space<vmem>>, %arg12: memref<64x32xf32, #tpu.memory_space<vmem>>, %arg13: memref<8x32xf32, #tpu.memory_space<vmem>>) attributes {dimension_semantics = [#tpu.dimension_semantics<arbitrary>], iteration_bounds = array<i64: 1>, scalar_prefetch = 0 : i64, scratch_operands = 0 : i64, tpu.core_type = #tpu.core_type<tc>, window_params = [{pipeline_mode = #tpu.pipeline_mode<synchronous>, transform_indices = @transform_0, window_bounds = array<i64: 8, 32>}, {pipeline_mode = #tpu.pipeline_mode<synchronous>, transform_indices = @transform_1, window_bounds = array<i64: 1, 32>}, {pipeline_mode = #tpu.pipeline_mode<synchronous>, transform_indices = @transform_2, window_bounds = array<i64: 1, 32>}, {pipeline_mode = #tpu.pipeline_mode<synchronous>, transform_indices = @transform_3, window_bounds = array<i64: 32, 64>}, {pipeline_mode = #tpu.pipeline_mode<synchronous>, transform_indices = @transform_4, window_bounds = array<i64: 1, 64>}, {pipeline_mode = #tpu.pipeline_mode<synchronous>, transform_indices = @transform_5, window_bounds = array<i64: 8, 64>}, {pipeline_mode = #tpu.pipeline_mode<synchronous>, transform_indices = @transform_6, window_bounds = array<i64: 8, 64>}, {pipeline_mode = #tpu.pipeline_mode<synchronous>, transform_indices = @transform_7, window_bounds = array<i64: 64, 64>}, {pipeline_mode = #tpu.pipeline_mode<synchronous>, transform_indices = @transform_8, window_bounds = array<i64: 32, 32>}, {pipeline_mode = #tpu.pipeline_mode<synchronous>, transform_indices = @transform_9, window_bounds = array<i64: 32, 64>}, {pipeline_mode = #tpu.pipeline_mode<synchronous>, transform_indices = @transform_10, window_bounds = array<i64: 32, 64>}, {pipeline_mode = #tpu.pipeline_mode<synchronous>, transform_indices = @transform_11, window_bounds = array<i64: 64, 32>}, {pipeline_mode = #tpu.pipeline_mode<synchronous>, transform_indices = @transform_12, window_bounds = array<i64: 8, 32>}]} {
    %c0 = arith.constant 0 : index
    %c0_0 = arith.constant 0 : index
    %0 = vector.load %arg1[%c0, %c0_0] : memref<8x32xf32, #tpu.memory_space<vmem>>, vector<8x32xf32>
    %c0_1 = arith.constant 0 : index
    %c0_2 = arith.constant 0 : index
    %1 = vector.load %arg2[%c0_1, %c0_2] : memref<1x32xf32, #tpu.memory_space<vmem>>, vector<1x32xf32>
    %2 = arith.mulf %0, %0 : vector<8x32xf32>
    %cst = arith.constant dense<0.000000e+00> : vector<8xf32>
    %3 = vector.multi_reduction <add>, %2, %cst [1] : vector<8x32xf32> to vector<8xf32>
    %4 = vector.shape_cast %3 : vector<8xf32> to vector<8x1xf32>
    %cst_3 = arith.constant 3.200000e+01 : f32
    %5 = vector.broadcast %cst_3 : f32 to vector<8x1xf32>
    %6 = arith.divf %4, %5 : vector<8x1xf32>
    %cst_4 = arith.constant 9.99999974E-6 : f32
    %7 = vector.broadcast %cst_4 : f32 to vector<8x1xf32>
    %8 = arith.addf %6, %7 : vector<8x1xf32>
    %9 = math.rsqrt %8 : vector<8x1xf32>
    %10 = vector.broadcast %9 : vector<8x1xf32> to vector<8x32xf32>
    %11 = arith.mulf %0, %10 : vector<8x32xf32>
    %12 = vector.broadcast %1 : vector<1x32xf32> to vector<8x32xf32>
    %13 = arith.mulf %11, %12 : vector<8x32xf32>
    %c0_5 = arith.constant 0 : index
    %c0_6 = arith.constant 0 : index
    %14 = vector.load %arg4[%c0_5, %c0_6] : memref<32x64xf32, #tpu.memory_space<vmem>>, vector<32x64xf32>
    %cst_7 = arith.constant dense<0.000000e+00> : vector<8x64xf32>
    %15 = tpu.matmul %13, %14, %cst_7 {dimension_numbers = #tpu.dot_dimension_numbers<[1], [0], [0], [1], [0, 0, 1, 1], [], []>} : vector<8x32xf32>, vector<32x64xf32>, vector<8x64xf32> -> vector<8x64xf32>
    %c0_8 = arith.constant 0 : index
    %c0_9 = arith.constant 0 : index
    %16 = vector.load %arg5[%c0_8, %c0_9] : memref<1x64xf32, #tpu.memory_space<vmem>>, vector<1x64xf32>
    %17 = vector.broadcast %16 : vector<1x64xf32> to vector<8x64xf32>
    %18 = arith.addf %15, %17 : vector<8x64xf32>
    %c0_10 = arith.constant 0 : index
    %c0_11 = arith.constant 0 : index
    %19 = vector.load %arg8[%c0_10, %c0_11] : memref<64x64xf32, #tpu.memory_space<vmem>>, vector<64x64xf32>
    %cst_12 = arith.constant dense<0.000000e+00> : vector<8x64xf32>
    %20 = tpu.matmul %18, %19, %cst_12 {dimension_numbers = #tpu.dot_dimension_numbers<[1], [0], [0], [1], [0, 0, 1, 1], [], []>} : vector<8x64xf32>, vector<64x64xf32>, vector<8x64xf32> -> vector<8x64xf32>
    %c0_13 = arith.constant 0 : index
    %c0_14 = arith.constant 0 : index
    %21 = vector.load %arg6[%c0_13, %c0_14] : memref<8x64xf32, #tpu.memory_space<vmem>>, vector<8x64xf32>
    %22 = arith.mulf %18, %21 : vector<8x64xf32>
    %c0_15 = arith.constant 0 : index
    %c0_16 = arith.constant 0 : index
    %23 = vector.load %arg7[%c0_15, %c0_16] : memref<8x64xf32, #tpu.memory_space<vmem>>, vector<8x64xf32>
    %24 = arith.mulf %20, %23 : vector<8x64xf32>
    %25 = arith.addf %22, %24 : vector<8x64xf32>
    %26 = vector.extract_strided_slice %25 {offsets = [0, 0], sizes = [8, 32], strides = [1, 1]} : vector<8x64xf32> to vector<8x32xf32>
    %27 = vector.extract_strided_slice %25 {offsets = [0, 32], sizes = [8, 16], strides = [1, 1]} : vector<8x64xf32> to vector<8x16xf32>
    %28 = vector.extract_strided_slice %25 {offsets = [0, 48], sizes = [8, 16], strides = [1, 1]} : vector<8x64xf32> to vector<8x16xf32>
    %29 = tpu.iota {dimensions = array<i32: 0>} : vector<8x8xi32>
    %30 = tpu.iota {dimensions = array<i32: 1>} : vector<8x8xi32>
    %31 = arith.cmpi sle, %30, %29 : vector<8x8xi32>
    %cst_17 = arith.constant 0.000000e+00 : f32
    %32 = vector.broadcast %cst_17 : f32 to vector<8x32xf32>
    %33 = vector.extract_strided_slice %26 {offsets = [0, 0], sizes = [8, 8], strides = [1, 1]} : vector<8x32xf32> to vector<8x8xf32>
    %34 = vector.extract_strided_slice %27 {offsets = [0, 0], sizes = [8, 8], strides = [1, 1]} : vector<8x16xf32> to vector<8x8xf32>
    %35 = vector.extract_strided_slice %28 {offsets = [0, 0], sizes = [8, 8], strides = [1, 1]} : vector<8x16xf32> to vector<8x8xf32>
    %cst_18 = arith.constant dense<0.000000e+00> : vector<8x8xf32>
    %36 = tpu.matmul %33, %34, %cst_18 {dimension_numbers = #tpu.dot_dimension_numbers<[1], [1], [0], [0], [0, 0, 1, 0], [], []>} : vector<8x8xf32>, vector<8x8xf32>, vector<8x8xf32> -> vector<8x8xf32>
    %cst_19 = arith.constant 0.353553385 : f32
    %37 = vector.broadcast %cst_19 : f32 to vector<8x8xf32>
    %38 = arith.mulf %36, %37 : vector<8x8xf32>
    %cst_20 = arith.constant -1.000000e+30 : f32
    %39 = vector.broadcast %cst_20 : f32 to vector<8x8xf32>
    %40 = arith.select %31, %38, %39 : vector<8x8xi1>, vector<8x8xf32>
    %cst_21 = arith.constant dense<0xFF800000> : vector<8xf32>
    %41 = vector.multi_reduction <maximumf>, %40, %cst_21 [1] : vector<8x8xf32> to vector<8xf32>
    %42 = vector.shape_cast %41 : vector<8xf32> to vector<8x1xf32>
    %43 = vector.broadcast %42 : vector<8x1xf32> to vector<8x8xf32>
    %44 = arith.subf %40, %43 : vector<8x8xf32>
    %45 = math.exp %44 : vector<8x8xf32>
    %cst_22 = arith.constant dense<0.000000e+00> : vector<8xf32>
    %46 = vector.multi_reduction <add>, %45, %cst_22 [1] : vector<8x8xf32> to vector<8xf32>
    %47 = vector.shape_cast %46 : vector<8xf32> to vector<8x1xf32>
    %48 = tpu.reciprocal %47 {approx = true} : vector<8x1xf32> -> vector<8x1xf32>
    %49 = vector.broadcast %48 : vector<8x1xf32> to vector<8x8xf32>
    %50 = arith.mulf %45, %49 : vector<8x8xf32>
    %cst_23 = arith.constant dense<0.000000e+00> : vector<8x8xf32>
    %51 = tpu.matmul %50, %35, %cst_23 {dimension_numbers = #tpu.dot_dimension_numbers<[1], [0], [0], [1], [0, 0, 1, 1], [], []>} : vector<8x8xf32>, vector<8x8xf32>, vector<8x8xf32> -> vector<8x8xf32>
    %c0_24 = arith.constant 0 : index
    %c0_25 = arith.constant 0 : index
    %52 = vector.load %arg9[%c0_24, %c0_25] : memref<32x32xf32, #tpu.memory_space<vmem>>, vector<8x32xf32>
    %cst_26 = arith.constant dense<0.000000e+00> : vector<8x32xf32>
    %53 = tpu.matmul %51, %52, %cst_26 {dimension_numbers = #tpu.dot_dimension_numbers<[1], [0], [0], [1], [0, 0, 1, 1], [], []>} : vector<8x8xf32>, vector<8x32xf32>, vector<8x32xf32> -> vector<8x32xf32>
    %54 = arith.addf %32, %53 : vector<8x32xf32>
    %55 = vector.extract_strided_slice %26 {offsets = [0, 8], sizes = [8, 8], strides = [1, 1]} : vector<8x32xf32> to vector<8x8xf32>
    %56 = vector.extract_strided_slice %27 {offsets = [0, 0], sizes = [8, 8], strides = [1, 1]} : vector<8x16xf32> to vector<8x8xf32>
    %57 = vector.extract_strided_slice %28 {offsets = [0, 0], sizes = [8, 8], strides = [1, 1]} : vector<8x16xf32> to vector<8x8xf32>
    %cst_27 = arith.constant dense<0.000000e+00> : vector<8x8xf32>
    %58 = tpu.matmul %55, %56, %cst_27 {dimension_numbers = #tpu.dot_dimension_numbers<[1], [1], [0], [0], [0, 0, 1, 0], [], []>} : vector<8x8xf32>, vector<8x8xf32>, vector<8x8xf32> -> vector<8x8xf32>
    %cst_28 = arith.constant 0.353553385 : f32
    %59 = vector.broadcast %cst_28 : f32 to vector<8x8xf32>
    %60 = arith.mulf %58, %59 : vector<8x8xf32>
    %cst_29 = arith.constant -1.000000e+30 : f32
    %61 = vector.broadcast %cst_29 : f32 to vector<8x8xf32>
    %62 = arith.select %31, %60, %61 : vector<8x8xi1>, vector<8x8xf32>
    %cst_30 = arith.constant dense<0xFF800000> : vector<8xf32>
    %63 = vector.multi_reduction <maximumf>, %62, %cst_30 [1] : vector<8x8xf32> to vector<8xf32>
    %64 = vector.shape_cast %63 : vector<8xf32> to vector<8x1xf32>
    %65 = vector.broadcast %64 : vector<8x1xf32> to vector<8x8xf32>
    %66 = arith.subf %62, %65 : vector<8x8xf32>
    %67 = math.exp %66 : vector<8x8xf32>
    %cst_31 = arith.constant dense<0.000000e+00> : vector<8xf32>
    %68 = vector.multi_reduction <add>, %67, %cst_31 [1] : vector<8x8xf32> to vector<8xf32>
    %69 = vector.shape_cast %68 : vector<8xf32> to vector<8x1xf32>
    %70 = tpu.reciprocal %69 {approx = true} : vector<8x1xf32> -> vector<8x1xf32>
    %71 = vector.broadcast %70 : vector<8x1xf32> to vector<8x8xf32>
    %72 = arith.mulf %67, %71 : vector<8x8xf32>
    %cst_32 = arith.constant dense<0.000000e+00> : vector<8x8xf32>
    %73 = tpu.matmul %72, %57, %cst_32 {dimension_numbers = #tpu.dot_dimension_numbers<[1], [0], [0], [1], [0, 0, 1, 1], [], []>} : vector<8x8xf32>, vector<8x8xf32>, vector<8x8xf32> -> vector<8x8xf32>
    %c8 = arith.constant 8 : index
    %c0_33 = arith.constant 0 : index
    %74 = vector.load %arg9[%c8, %c0_33] : memref<32x32xf32, #tpu.memory_space<vmem>>, vector<8x32xf32>
    %cst_34 = arith.constant dense<0.000000e+00> : vector<8x32xf32>
    %75 = tpu.matmul %73, %74, %cst_34 {dimension_numbers = #tpu.dot_dimension_numbers<[1], [0], [0], [1], [0, 0, 1, 1], [], []>} : vector<8x8xf32>, vector<8x32xf32>, vector<8x32xf32> -> vector<8x32xf32>
    %76 = arith.addf %54, %75 : vector<8x32xf32>
    %77 = vector.extract_strided_slice %26 {offsets = [0, 16], sizes = [8, 8], strides = [1, 1]} : vector<8x32xf32> to vector<8x8xf32>
    %78 = vector.extract_strided_slice %27 {offsets = [0, 8], sizes = [8, 8], strides = [1, 1]} : vector<8x16xf32> to vector<8x8xf32>
    %79 = vector.extract_strided_slice %28 {offsets = [0, 8], sizes = [8, 8], strides = [1, 1]} : vector<8x16xf32> to vector<8x8xf32>
    %cst_35 = arith.constant dense<0.000000e+00> : vector<8x8xf32>
    %80 = tpu.matmul %77, %78, %cst_35 {dimension_numbers = #tpu.dot_dimension_numbers<[1], [1], [0], [0], [0, 0, 1, 0], [], []>} : vector<8x8xf32>, vector<8x8xf32>, vector<8x8xf32> -> vector<8x8xf32>
    %cst_36 = arith.constant 0.353553385 : f32
    %81 = vector.broadcast %cst_36 : f32 to vector<8x8xf32>
    %82 = arith.mulf %80, %81 : vector<8x8xf32>
    %cst_37 = arith.constant -1.000000e+30 : f32
    %83 = vector.broadcast %cst_37 : f32 to vector<8x8xf32>
    %84 = arith.select %31, %82, %83 : vector<8x8xi1>, vector<8x8xf32>
    %cst_38 = arith.constant dense<0xFF800000> : vector<8xf32>
    %85 = vector.multi_reduction <maximumf>, %84, %cst_38 [1] : vector<8x8xf32> to vector<8xf32>
    %86 = vector.shape_cast %85 : vector<8xf32> to vector<8x1xf32>
    %87 = vector.broadcast %86 : vector<8x1xf32> to vector<8x8xf32>
    %88 = arith.subf %84, %87 : vector<8x8xf32>
    %89 = math.exp %88 : vector<8x8xf32>
    %cst_39 = arith.constant dense<0.000000e+00> : vector<8xf32>
    %90 = vector.multi_reduction <add>, %89, %cst_39 [1] : vector<8x8xf32> to vector<8xf32>
    %91 = vector.shape_cast %90 : vector<8xf32> to vector<8x1xf32>
    %92 = tpu.reciprocal %91 {approx = true} : vector<8x1xf32> -> vector<8x1xf32>
    %93 = vector.broadcast %92 : vector<8x1xf32> to vector<8x8xf32>
    %94 = arith.mulf %89, %93 : vector<8x8xf32>
    %cst_40 = arith.constant dense<0.000000e+00> : vector<8x8xf32>
    %95 = tpu.matmul %94, %79, %cst_40 {dimension_numbers = #tpu.dot_dimension_numbers<[1], [0], [0], [1], [0, 0, 1, 1], [], []>} : vector<8x8xf32>, vector<8x8xf32>, vector<8x8xf32> -> vector<8x8xf32>
    %c16 = arith.constant 16 : index
    %c0_41 = arith.constant 0 : index
    %96 = vector.load %arg9[%c16, %c0_41] : memref<32x32xf32, #tpu.memory_space<vmem>>, vector<8x32xf32>
    %cst_42 = arith.constant dense<0.000000e+00> : vector<8x32xf32>
    %97 = tpu.matmul %95, %96, %cst_42 {dimension_numbers = #tpu.dot_dimension_numbers<[1], [0], [0], [1], [0, 0, 1, 1], [], []>} : vector<8x8xf32>, vector<8x32xf32>, vector<8x32xf32> -> vector<8x32xf32>
    %98 = arith.addf %76, %97 : vector<8x32xf32>
    %99 = vector.extract_strided_slice %26 {offsets = [0, 24], sizes = [8, 8], strides = [1, 1]} : vector<8x32xf32> to vector<8x8xf32>
    %100 = vector.extract_strided_slice %27 {offsets = [0, 8], sizes = [8, 8], strides = [1, 1]} : vector<8x16xf32> to vector<8x8xf32>
    %101 = vector.extract_strided_slice %28 {offsets = [0, 8], sizes = [8, 8], strides = [1, 1]} : vector<8x16xf32> to vector<8x8xf32>
    %cst_43 = arith.constant dense<0.000000e+00> : vector<8x8xf32>
    %102 = tpu.matmul %99, %100, %cst_43 {dimension_numbers = #tpu.dot_dimension_numbers<[1], [1], [0], [0], [0, 0, 1, 0], [], []>} : vector<8x8xf32>, vector<8x8xf32>, vector<8x8xf32> -> vector<8x8xf32>
    %cst_44 = arith.constant 0.353553385 : f32
    %103 = vector.broadcast %cst_44 : f32 to vector<8x8xf32>
    %104 = arith.mulf %102, %103 : vector<8x8xf32>
    %cst_45 = arith.constant -1.000000e+30 : f32
    %105 = vector.broadcast %cst_45 : f32 to vector<8x8xf32>
    %106 = arith.select %31, %104, %105 : vector<8x8xi1>, vector<8x8xf32>
    %cst_46 = arith.constant dense<0xFF800000> : vector<8xf32>
    %107 = vector.multi_reduction <maximumf>, %106, %cst_46 [1] : vector<8x8xf32> to vector<8xf32>
    %108 = vector.shape_cast %107 : vector<8xf32> to vector<8x1xf32>
    %109 = vector.broadcast %108 : vector<8x1xf32> to vector<8x8xf32>
    %110 = arith.subf %106, %109 : vector<8x8xf32>
    %111 = math.exp %110 : vector<8x8xf32>
    %cst_47 = arith.constant dense<0.000000e+00> : vector<8xf32>
    %112 = vector.multi_reduction <add>, %111, %cst_47 [1] : vector<8x8xf32> to vector<8xf32>
    %113 = vector.shape_cast %112 : vector<8xf32> to vector<8x1xf32>
    %114 = tpu.reciprocal %113 {approx = true} : vector<8x1xf32> -> vector<8x1xf32>
    %115 = vector.broadcast %114 : vector<8x1xf32> to vector<8x8xf32>
    %116 = arith.mulf %111, %115 : vector<8x8xf32>
    %cst_48 = arith.constant dense<0.000000e+00> : vector<8x8xf32>
    %117 = tpu.matmul %116, %101, %cst_48 {dimension_numbers = #tpu.dot_dimension_numbers<[1], [0], [0], [1], [0, 0, 1, 1], [], []>} : vector<8x8xf32>, vector<8x8xf32>, vector<8x8xf32> -> vector<8x8xf32>
    %c24 = arith.constant 24 : index
    %c0_49 = arith.constant 0 : index
    %118 = vector.load %arg9[%c24, %c0_49] : memref<32x32xf32, #tpu.memory_space<vmem>>, vector<8x32xf32>
    %cst_50 = arith.constant dense<0.000000e+00> : vector<8x32xf32>
    %119 = tpu.matmul %117, %118, %cst_50 {dimension_numbers = #tpu.dot_dimension_numbers<[1], [0], [0], [1], [0, 0, 1, 1], [], []>} : vector<8x8xf32>, vector<8x32xf32>, vector<8x32xf32> -> vector<8x32xf32>
    %120 = arith.addf %98, %119 : vector<8x32xf32>
    %121 = arith.addf %0, %120 : vector<8x32xf32>
    %c0_51 = arith.constant 0 : index
    %c0_52 = arith.constant 0 : index
    %122 = vector.load %arg3[%c0_51, %c0_52] : memref<1x32xf32, #tpu.memory_space<vmem>>, vector<1x32xf32>
    %123 = arith.mulf %121, %121 : vector<8x32xf32>
    %cst_53 = arith.constant dense<0.000000e+00> : vector<8xf32>
    %124 = vector.multi_reduction <add>, %123, %cst_53 [1] : vector<8x32xf32> to vector<8xf32>
    %125 = vector.shape_cast %124 : vector<8xf32> to vector<8x1xf32>
    %cst_54 = arith.constant 3.200000e+01 : f32
    %126 = vector.broadcast %cst_54 : f32 to vector<8x1xf32>
    %127 = arith.divf %125, %126 : vector<8x1xf32>
    %cst_55 = arith.constant 9.99999974E-6 : f32
    %128 = vector.broadcast %cst_55 : f32 to vector<8x1xf32>
    %129 = arith.addf %127, %128 : vector<8x1xf32>
    %130 = math.rsqrt %129 : vector<8x1xf32>
    %131 = vector.broadcast %130 : vector<8x1xf32> to vector<8x32xf32>
    %132 = arith.mulf %121, %131 : vector<8x32xf32>
    %133 = vector.broadcast %122 : vector<1x32xf32> to vector<8x32xf32>
    %134 = arith.mulf %132, %133 : vector<8x32xf32>
    %c0_56 = arith.constant 0 : index
    %c0_57 = arith.constant 0 : index
    %135 = vector.load %arg10[%c0_56, %c0_57] : memref<32x64xf32, #tpu.memory_space<vmem>>, vector<32x64xf32>
    %cst_58 = arith.constant dense<0.000000e+00> : vector<8x64xf32>
    %136 = tpu.matmul %134, %135, %cst_58 {dimension_numbers = #tpu.dot_dimension_numbers<[1], [0], [0], [1], [0, 0, 1, 1], [], []>} : vector<8x32xf32>, vector<32x64xf32>, vector<8x64xf32> -> vector<8x64xf32>
    %c0_59 = arith.constant 0 : index
    %c0_60 = arith.constant 0 : index
    %137 = vector.load %arg11[%c0_59, %c0_60] : memref<32x64xf32, #tpu.memory_space<vmem>>, vector<32x64xf32>
    %cst_61 = arith.constant dense<0.000000e+00> : vector<8x64xf32>
    %138 = tpu.matmul %134, %137, %cst_61 {dimension_numbers = #tpu.dot_dimension_numbers<[1], [0], [0], [1], [0, 0, 1, 1], [], []>} : vector<8x32xf32>, vector<32x64xf32>, vector<8x64xf32> -> vector<8x64xf32>
    %139 = arith.negf %136 : vector<8x64xf32>
    %140 = math.exp %139 : vector<8x64xf32>
    %cst_62 = arith.constant 1.000000e+00 : f32
    %141 = vector.broadcast %cst_62 : f32 to vector<8x64xf32>
    %142 = arith.addf %141, %140 : vector<8x64xf32>
    %143 = arith.divf %141, %142 : vector<8x64xf32>
    %144 = arith.mulf %136, %143 : vector<8x64xf32>
    %145 = arith.mulf %144, %138 : vector<8x64xf32>
    %c0_63 = arith.constant 0 : index
    %c0_64 = arith.constant 0 : index
    %146 = vector.load %arg12[%c0_63, %c0_64] : memref<64x32xf32, #tpu.memory_space<vmem>>, vector<64x32xf32>
    %cst_65 = arith.constant dense<0.000000e+00> : vector<8x32xf32>
    %147 = tpu.matmul %145, %146, %cst_65 {dimension_numbers = #tpu.dot_dimension_numbers<[1], [0], [0], [1], [0, 0, 1, 1], [], []>} : vector<8x64xf32>, vector<64x32xf32>, vector<8x32xf32> -> vector<8x32xf32>
    %148 = arith.addf %147, %121 : vector<8x32xf32>
    %c0_66 = arith.constant 0 : index
    %c0_67 = arith.constant 0 : index
    %149 = vector.load %arg13[%c0_66, %c0_67] : memref<8x32xf32, #tpu.memory_space<vmem>>, vector<8x32xf32>
    tpu.vector_store %arg13[%c0_66, %c0_67], %148 {strides = array<i32>} : memref<8x32xf32, #tpu.memory_space<vmem>>, vector<8x32xf32>,
    return
  }
  func.func @transform_0(%arg0: i32) -> (i32, i32) {
    %c0_i32 = arith.constant 0 : i32
    %c0_i32_0 = arith.constant 0 : i32
    %c0_i32_1 = arith.constant 0 : i32
    return %c0_i32, %c0_i32_0 : i32, i32
  }
  func.func @transform_1(%arg0: i32) -> (i32, i32) {
    %c0_i32 = arith.constant 0 : i32
    %c0_i32_0 = arith.constant 0 : i32
    %c0_i32_1 = arith.constant 0 : i32
    return %c0_i32, %c0_i32_0 : i32, i32
  }
  func.func @transform_2(%arg0: i32) -> (i32, i32) {
    %c0_i32 = arith.constant 0 : i32
    %c0_i32_0 = arith.constant 0 : i32
    %c0_i32_1 = arith.constant 0 : i32
    return %c0_i32, %c0_i32_0 : i32, i32
  }
  func.func @transform_3(%arg0: i32) -> (i32, i32) {
    %c0_i32 = arith.constant 0 : i32
    %c0_i32_0 = arith.constant 0 : i32
    %c0_i32_1 = arith.constant 0 : i32
    return %c0_i32, %c0_i32_0 : i32, i32
  }
  func.func @transform_4(%arg0: i32) -> (i32, i32) {
    %c0_i32 = arith.constant 0 : i32
    %c0_i32_0 = arith.constant 0 : i32
    %c0_i32_1 = arith.constant 0 : i32
    return %c0_i32, %c0_i32_0 : i32, i32
  }
  func.func @transform_5(%arg0: i32) -> (i32, i32) {
    %c0_i32 = arith.constant 0 : i32
    %c0_i32_0 = arith.constant 0 : i32
    %c0_i32_1 = arith.constant 0 : i32
    return %c0_i32, %c0_i32_0 : i32, i32
  }
  func.func @transform_6(%arg0: i32) -> (i32, i32) {
    %c0_i32 = arith.constant 0 : i32
    %c0_i32_0 = arith.constant 0 : i32
    %c0_i32_1 = arith.constant 0 : i32
    return %c0_i32, %c0_i32_0 : i32, i32
  }
  func.func @transform_7(%arg0: i32) -> (i32, i32) {
    %c0_i32 = arith.constant 0 : i32
    %c0_i32_0 = arith.constant 0 : i32
    %c0_i32_1 = arith.constant 0 : i32
    return %c0_i32, %c0_i32_0 : i32, i32
  }
  func.func @transform_8(%arg0: i32) -> (i32, i32) {
    %c0_i32 = arith.constant 0 : i32
    %c0_i32_0 = arith.constant 0 : i32
    %c0_i32_1 = arith.constant 0 : i32
    return %c0_i32, %c0_i32_0 : i32, i32
  }
  func.func @transform_9(%arg0: i32) -> (i32, i32) {
    %c0_i32 = arith.constant 0 : i32
    %c0_i32_0 = arith.constant 0 : i32
    %c0_i32_1 = arith.constant 0 : i32
    return %c0_i32, %c0_i32_0 : i32, i32
  }
  func.func @transform_10(%arg0: i32) -> (i32, i32) {
    %c0_i32 = arith.constant 0 : i32
    %c0_i32_0 = arith.constant 0 : i32
    %c0_i32_1 = arith.constant 0 : i32
    return %c0_i32, %c0_i32_0 : i32, i32
  }
  func.func @transform_11(%arg0: i32) -> (i32, i32) {
    %c0_i32 = arith.constant 0 : i32
    %c0_i32_0 = arith.constant 0 : i32
    %c0_i32_1 = arith.constant 0 : i32
    return %c0_i32, %c0_i32_0 : i32, i32
  }
  func.func @transform_12(%arg0: i32) -> (i32, i32) {
    %c0_i32 = arith.constant 0 : i32
    %c0_i32_0 = arith.constant 0 : i32
    %c0_i32_1 = arith.constant 0 : i32
    return %c0_i32, %c0_i32_0 : i32, i32
  }
}

</mosaic_0001>

<bundles_post_ra>
// kernel: tile.14
= control target key start
LH: loop header
LB: loop body
LE: loop exit
PB: predicated region body
PF: predicated region fallthrough
CT: control target
= control target key end

     0   :  { %vm4_vm0 = vcmask 1047556   ;;  %s73_s14 = smov 40   ;;  %s74_s19 = smov 24   ;;  %vm6_vm1 = vcmask 64512   ;;  %vm16_vm2 = vcmask 392512   ;;  %vm26_vm3 = vcmask 326912   ;;  %s148_s0 = inlined_call_operand.vmem [shape: f32[8,6,8], index: 0, kind: input, shape index: {}]   ;;  %s149_s1 = inlined_call_operand.vmem [shape: f32[8,48], index: 1, kind: output, shape index: {}]  }
   0x1   :  { %v58_v0 = vld [vmem:[%s148_s0 + $0x5] ss:$8 sm:$0xf]   ;;  %v62_v3 = vld [vmem:[%s148_s0 + $0x3] ss:$8 sm:$0xf]  }
   0x2   :  { %v59_v1 = vld [vmem:[%s148_s0 + $0x5] ss:$8 sm:$0xf0]   ;;  %v63_v4 = vld [vmem:[%s148_s0 + $0x3] ss:$8 sm:$0xf0]  }
   0x3   :  { %v13_v2 = vsel %vm4_vm0, %v59_v1, %v58_v0  ;;  %v33_v5 = vsel %vm4_vm0, %v63_v4, %v62_v3  ;;  %v60_v6 = vld [vmem:[%s148_s0 + $0x4] ss:$8 sm:$0xf]   ;;  %v64_v9 = vld [vmem:[%s148_s0 + $0x2] ss:$8 sm:$0xf]  }
   0x4   :  { %14 = vrot.lane.b32.xlu0 %v13_v2, %s73_s14  ;;  %v61_v7 = vld [vmem:[%s148_s0 + $0x4] ss:$8 sm:$0xf0]   ;;  %34 = vrot.lane.b32.xlu1 %v33_v5, %s74_s19  ;;  %v65_v10 = vld [vmem:[%s148_s0 + $0x2] ss:$8 sm:$0xf0]  }
   0x5   :  { %v23_v8 = vsel %vm4_vm0, %v61_v7, %v60_v6  ;;  %v66_v11 = vld [vmem:[%s148_s0 + $0x1] ss:$8 sm:$0xf]   ;;  %v43_v12 = vsel %vm4_vm0, %v65_v10, %v64_v9  ;;  %s75_s28 = smov 32   ;;  %s77_s6 = smov 8   ;;  %vm36_vm4 = vcmask 261312  }
   0x6   :  { %v67_v13 = vld [vmem:[%s148_s0 + $0x1] ss:$8 sm:$0xf0]   ;;  %v2_v14 = vld [vmem:[%s148_s0] ss:$8 sm:$0xf]  }
   0x7   :  { %v3_v15 = vld [vmem:[%s148_s0] ss:$8 sm:$0xf0]   ;;  %s76_s0 = smov 16   ;;  %v53_v16 = vsel %vm4_vm0, %v67_v13, %v66_v11  ;;  %vm46_vm5 = vcmask 195712   ;;  %vm56_vm6 = vcmask 130112  }
   0x8   :  { %24 = vrot.lane.b32.xlu0 %v23_v8, %s75_s28  ;;  %44 = vrot.lane.b32.xlu1 %v43_v12, %s76_s0  ;;  %v5_v17 = vsel %vm4_vm0, %v3_v15, %v2_v14 }
   0x9   :  { %7 = vst.msk [vmem:[%s149_s1] sm:$0xff] %vm6_vm1, %v5_v17  }
   0xc   :  { %54 = vrot.lane.b32.xlu0 %v53_v16, %s77_s6 }
  0x76   :  { %v15_v18 = vpop.permute.xlu0 %14   ;;  %v35_v19 = vpop.permute.xlu1 %34  }
  0x77   :  { %17 = vst.msk [vmem:[%s149_s1] sm:$0xff] %vm16_vm2, %v15_v18  }
  0x7a   :  { %v25_v20 = vpop.permute.xlu0 %24   ;;  %v45_v21 = vpop.permute.xlu1 %44  }
  0x7b   :  { %27 = vst.msk [vmem:[%s149_s1] sm:$0xff] %vm26_vm3, %v25_v20  }
  0x7c   :  { %37 = vst.msk [vmem:[%s149_s1] sm:$0xff] %vm36_vm4, %v35_v19  }
  0x7d   :  { %47 = vst.msk [vmem:[%s149_s1] sm:$0xff] %vm46_vm5, %v45_v21  }
  0x7e   :  { %v55_v22 = vpop.permute.xlu0 %54  }
  0x7f   :  { %57 = vst.msk [vmem:[%s149_s1] sm:$0xff] %vm56_vm6, %v55_v22  }

// kernel: glm_block_forward.1
= control target key start
LH: loop header
LB: loop body
LE: loop exit
PB: predicated region body
PF: predicated region fallthrough
CT: control target
= control target key end

     0   :  { %vm45_vm0 = vcmask 261120   ;;  %s2109_s0 = inlined_call_operand.vmem [shape: f32[8,32], index: 0, kind: input, shape index: {}]   ;;  %s2110_s1 = inlined_call_operand.vmem [shape: f32[1,32], index: 1, kind: input, shape index: {}]   ;;  %s2111_s2 = inlined_call_operand.vmem [shape: f32[1,32], index: 2, kind: input, shape index: {}]   ;;  %s2112_s3 = inlined_call_operand.vmem [shape: f32[32,64], index: 3, kind: input, shape index: {}]   ;;  %s2113_s4 = inlined_call_operand.vmem [shape: f32[1,64], index: 4, kind: input, shape index: {}]   ;;  %s2114_s5 = inlined_call_operand.vmem [shape: f32[8,64], index: 5, kind: input, shape index: {}]   ;;  %s2115_s6 = inlined_call_operand.vmem [shape: f32[8,64], index: 6, kind: input, shape index: {}]   ;;  %s2116_s7 = inlined_call_operand.vmem [shape: f32[64,64], index: 7, kind: input, shape index: {}]   ;;  %s2117_s8 = inlined_call_operand.vmem [shape: f32[32,32], index: 8, kind: input, shape index: {}]   ;;  %s2118_s9 = inlined_call_operand.vmem [shape: f32[32,64], index: 9, kind: input, shape index: {}]   ;;  %s2119_s10 = inlined_call_operand.vmem [shape: f32[32,64], index: 10, kind: input, shape index: {}]   ;;  %s2120_s11 = inlined_call_operand.vmem [shape: f32[64,32], index: 11, kind: input, shape index: {}]   ;;  %s2121_s12 = inlined_call_operand.hbm [shape: f32[8,32], index: 12, kind: output, shape index: {}]  }
   0x1   :  { %v1854_v0 = vld [vmem:[%s2109_s0] sm:$0xff] }
   0x2   :  { %17 = vsyncpa [#allocation3], 0  ;;  %v44_v1 = vmul.f32 %v1854_v0, %v1854_v0  ;;  %v61_v3 = vld [vmem:[%s2112_s3] sm:$0xff]  ;;  %v62_v4 = vld [vmem:[%s2112_s3 + $0x8] sm:$0xff]  ;;  %v1775_v6 = vmov 0.0|0.0   ;;  %vm1776_vm1 = vmmov 0   ;;  %v232_v42 = vlaneseq }
   0x3   :  { %v63_v5 = vld [vmem:[%s2112_s3 + $0x10] sm:$0xff]  ;;  %1674 = vmatprep.subr.bf16.mxu1 %v1775_v6  ;;  %v1675_v7 = vpack.c.bf16 %v62_v4, %v61_v3  ;;  %v64_v8 = vld [vmem:[%s2112_s3 + $0x18] sm:$0xff]  ;;  %v1777_v9 = vmov 0.0   ;;  %v145_v14 = vld [vmem:[%s2116_s7] sm:$0xff]  ;;  %vm153_vm2 = vcmask 523264   ;;  %vm240_vm3 = vcmask 64512  }
   0x4   :  { %v46_v2 = vsel %vm45_vm0, %v44_v1, 0.0  ;;  %1551 = vmatprep.mubr.msk.f32.mxu1 %vm1776_vm1, %v1777_v9  ;;  %1573 = vmatprep.subr.mxu0 %v1777_v9  ;;  %v1678_v10 = vpack.c.bf16 %v64_v8, %v63_v5  ;;  %v146_v15 = vld [vmem:[%s2116_s7 + $0x8] sm:$0xff]  ;;  %v1461_v17 = vld [vmem:[%s2110_s1] ss:$0 sm:$0xff]  ;;  %v147_v21 = vld [vmem:[%s2116_s7 + $0x10] sm:$0xff]  ;;  %v1935_v43 = vshrl.u32 %v232_v42, 7 }
   0x5   :  { %47 = vadd.xlane.f32.xlu0 %v46_v2  ;;  %1575 = vmatprep.mubr.msk.f32.mxu0 %vm1776_vm1, %v1777_v9  ;;  %v1681_v19 = vpack.c.bf16 %v146_v15, %v145_v14  ;;  %v148_v22 = vld [vmem:[%s2116_s7 + $0x18] sm:$0xff]  ;;  %v149_v24 = vld [vmem:[%s2116_s7 + $0x20] sm:$0xff]  ;;  %v150_v25 = vld [vmem:[%s2116_s7 + $0x28] sm:$0xff]  ;;  %v1937_v44 = vand.u32 127, %v232_v42  ;;  %s1781_s13 = smov 88   ;;  %s1782_s14 = smov 112  }
   0x6   :  { %1676 = vmatpush3.bf16.msra.mxu1 %v1675_v7  ;;  %v1684_v23 = vpack.c.bf16 %v148_v22, %v147_v21  ;;  %v1687_v26 = vpack.c.bf16 %v150_v25, %v149_v24  ;;  %v151_v27 = vld [vmem:[%s2116_s7 + $0x30] sm:$0xff]  ;;  %v152_v28 = vld [vmem:[%s2116_s7 + $0x38] sm:$0xff]  ;;  %v1462_v30 = vld [vmem:[%s2113_s4] ss:$0 sm:$0xff]  ;;  %s1778_s4 = smov 96   ;;  %s1783_s19 = smov 72  }
   0x7   :  { %1677 = vmatprep.subr.bf16.mxu1 %v1775_v6  ;;  %v1690_v29 = vpack.c.bf16 %v152_v28, %v151_v27  ;;  %v227_v34 = vld [vmem:[%s2114_s5] sm:$0xff]  ;;  %vm236_vm4 = vcmp.le.s32.totalorder %v1937_v44, %v1935_v43  ;;  %s1779_s5 = smov 80   ;;  %s1784_s20 = smov 104  }
   0x8   :  { %v229_v35 = vld [vmem:[%s2115_s6] sm:$0xff]  ;;  %s1780_s6 = smov 120   ;;  %s1785_s28 = smov [#allocation2]  }
   0x9   :  { %v404_v15 = vld [vmem:[%s2117_s8] sm:$0xff]  ;;  %s1453_s0 = sshll.u32 %s1785_s28, 4  ;;  %s1454_s0 = int_to_ptr.vmem [resolvable:$true] %s1453_s0 }
   0xa   :  { %1679 = vmatpush3.bf16.msra.mxu1 %v1678_v10  ;;  %p1756_p1 = scmp.lt.s32.totalorder %s1454_s0, %s1454_s0 }
   0xb   :  { %1680 = vmatprep.subr.bf16.mxu1 %v1775_v6 }
  0x92   :  { %v48_v11 = vpop.xlane.xlu0 %47 }
  0x93   :  { %v50_v12 = vmul.f32 0.03125, %v48_v11  ;;  %v565_v11 = vld [vmem:[%s2117_s8 + $0x8] sm:$0xff] }
  0x95   :  { %v51_v13 = vadd.f32 1e-05, %v50_v12 }
  0x97   :  { %1727 = vrsqrt.f32 %v51_v13 }
  0xa1   :  { %v1728_v16 = vpop.eup %1727 }
  0xa2   :  { %v53_v18 = vmul.f32 %v1728_v16, %v1854_v0 }
  0xa4   :  { %v60_v20 = vmul.f32 %v1461_v17, %v53_v18 }
  0xa6   :  { %1552 = vmatmul.mubr.msk.f32.vlgmr.msra.gmra.mrb[0].mxu1 %vm45_vm0, %v60_v20 }
  0xa7   :  { %1682 = vmatpush3.bf16.msra.mxu1 %v1681_v19  ;;  %1570 = vmatprep.mubr.msk.f32.mxu1 %vm1776_vm1, %v1777_v9 }
  0xa8   :  { %1683 = vmatprep.subr.bf16.mxu1 %v1775_v6 }
  0xab   :  { %1685 = vmatpush3.bf16.msra.mxu1 %v1684_v23 }
  0xac   :  { %1686 = vmatprep.subr.bf16.mxu1 %v1775_v6 }
  0xaf   :  { %1688 = vmatpush3.bf16.msra.mxu1 %v1687_v26 }
  0xb0   :  { %1689 = vmatprep.subr.bf16.mxu1 %v1775_v6 }
  0xb3   :  { %1691 = vmatpush3.bf16.msra.mxu1 %v1690_v29 }
  0xb4   :  { %1588 = vmatprep.subr.mxu1 %v1777_v9 }
 0x179   :  { %v141_v31 = vpop.f32.mrb[0].mxu1 }
 0x17a   :  { %v142_v32 = vadd.f32 %v1462_v30, %v141_v31  ;;  %v1553_v33 = vpop.f32.mrb[1].mxu1 }
 0x17c   :  { %1571 = vmatmul.mubr.msk.f32.vlgmr.msra.gmra.mrb[2].mxu1 %vm153_vm2, %v142_v32  ;;  %v228_v37 = vmul.f32 %v227_v34, %v142_v32 }
 0x17d   :  { %1590 = vmatprep.mubr.msk.f32.mxu1 %vm1776_vm1, %v1777_v9 }
 0x24f   :  { %v223_v36 = vpop.f32.mrb[2].mxu1 }
 0x250   :  { %v230_v38 = vmul.f32 %v229_v35, %v223_v36  ;;  %v1572_v39 = vpop.f32.mrb[3].mxu1  ;;  %v879_v36 = vld [vmem:[%s2117_s8 + $0x10] sm:$0xff] }
 0x252   :  { %v1926_v40 = vadd.f32 %v230_v38, %v228_v37 }
 0x254   :  { %238 = vrot.lane.b32.xlu0 %v1926_v40, %s1778_s4 }
 0x2c6   :  { %v239_v41 = vpop.permute.xlu0 %238 }
 0x2c7   :  { %1574 = vmatpush3.xpose.msk.msra.mxu0 %vm240_vm3, %v239_v41 }
 0x2c8   :  { %1578 = vmatprep.subr.mxu0 %v1777_v9 }
 0x2ca   :  { %1576 = vmatmul.mubr.msk.f32.vlgmr.msra.gmra.mrb[0].mxu0 %vm240_vm3, %v1926_v40 }
 0x2cb   :  { %1580 = vmatprep.mubr.msk.f32.mxu0 %vm1776_vm1, %v1777_v9 }
 0x39d   :  { %v311_v45 = vpop.f32.mrb[0].mxu0 }
 0x39e   :  { %v315_v46 = vmul.f32 0.35355338, %v311_v45  ;;  %v1577_v47 = vpop.f32.mrb[1].mxu0 }
 0x3a0   :  { %v316_v48 = vsel %vm236_vm4, %v315_v46, -1e+30 }
 0x3a1   :  { %v317_v49 = vsel %vm240_vm3, %v316_v48, -inf }
 0x3a2   :  { %318 = vmax.xlane.f32.xlu1 %v317_v49 }
 0x3b3   :  { %328 = vrot.lane.b32.xlu1 %v1926_v40, %s1779_s5 }
 0x42f   :  { %v319_v50 = vpop.xlane.xlu1 %318 }
 0x430   :  { %v320_v51 = vsub.f32 %v316_v48, %v319_v50 }
 0x432   :  { %v321_v52 = vmul.f32 1.442695, %v320_v51 }
 0x433   :  { %v329_v53 = vpop.permute.xlu1 %328 }
 0x434   :  { %1729 = vpow2.f32 %v321_v52  ;;  %1579 = vmatpush3.msra.mxu0 %v329_v53  ;;  %1589 = vmatpush3.msra.mxu1 %v329_v53 }
 0x435   :  { %1583 = vmatprep.subr.mxu0 %v1777_v9  ;;  %1598 = vmatprep.subr.mxu1 %v1777_v9 }
 0x43e   :  { %v1730_v54 = vpop.eup %1729 }
 0x43f   :  { %v323_v55 = vsel %vm240_vm3, %v1730_v54, 0.0 }
 0x440   :  { %324 = vadd.xlane.f32.xlu1 %v323_v55  ;;  %v1114_v55 = vld [vmem:[%s2117_s8 + $0x18] sm:$0xff] }
 0x451   :  { %405 = vrot.lane.b32.xlu1 %v1926_v40, %s1780_s6 }
 0x4cd   :  { %v325_v56 = vpop.xlane.xlu1 %324 }
 0x4ce   :  { %1731 = vrcp.f32 %v325_v56 }
 0x4d1   :  { %v406_v59 = vpop.permute.xlu1 %405 }
 0x4d8   :  { %v1732_v57 = vpop.eup %1731 }
 0x4d9   :  { %v327_v58 = vmul.f32 %v1732_v57, %v1730_v54 }
 0x4db   :  { %1581 = vmatmul.mubr.msk.f32.vlgmr.msra.gmra.mrb[2].mxu0 %vm240_vm3, %v327_v58 }
 0x4dc   :  { %1584 = vmatpush3.xpose.msk.msra.mxu0 %vm240_vm3, %v239_v41  ;;  %1585 = vmatprep.mubr.msk.f32.mxu0 %vm1776_vm1, %v1777_v9 }
 0x4dd   :  { %1593 = vmatprep.subr.mxu0 %v1777_v9 }
 0x4df   :  { %1586 = vmatmul.mubr.msk.f32.vlgmr.msra.gmra.mrb[4].mxu0 %vm240_vm3, %v406_v59 }
 0x4e0   :  { %1595 = vmatprep.mubr.msk.f32.mxu0 %vm1776_vm1, %v1777_v9  ;;  %1594 = vmatpush3.msra.mxu0 %v565_v11 }
 0x4e1   :  { %1603 = vmatprep.subr.mxu0 %v1777_v9 }
 0x5ae   :  { %v400_v60 = vpop.f32.mrb[2].mxu0 }
 0x5af   :  { %v1582_v61 = vpop.f32.mrb[3].mxu0 }
 0x5b2   :  { %v475_v62 = vpop.f32.mrb[4].mxu0 }
 0x5b3   :  { %v479_v63 = vmul.f32 0.35355338, %v475_v62  ;;  %v1587_v1 = vpop.f32.mrb[5].mxu0 }
 0x5b5   :  { %v480_v2 = vsel %vm236_vm4, %v479_v63, -1e+30 }
 0x5b6   :  { %v481_v3 = vsel %vm240_vm3, %v480_v2, -inf }
 0x5b7   :  { %482 = vmax.xlane.f32.xlu0 %v481_v3 }
 0x5cd   :  { %714 = vrot.lane.b32.xlu0 %v1926_v40, %s1781_s13 }
 0x644   :  { %v483_v4 = vpop.xlane.xlu0 %482 }
 0x645   :  { %v484_v5 = vsub.f32 %v480_v2, %v483_v4 }
 0x647   :  { %v485_v7 = vmul.f32 1.442695, %v484_v5  ;;  %v1206_v5 = vld [vmem:[%s2118_s9] sm:$0xff] }
 0x648   :  { %v715_v17 = vpop.permute.xlu0 %714 }
 0x649   :  { %1733 = vpow2.f32 %v485_v7  ;;  %v1207_v7 = vld [vmem:[%s2118_s9 + $0x8] sm:$0xff] }
 0x653   :  { %v1734_v8 = vpop.eup %1733 }
 0x654   :  { %v487_v10 = vsel %vm240_vm3, %v1734_v8, 0.0 }
 0x655   :  { %488 = vadd.xlane.f32.xlu1 %v487_v10  ;;  %v1284_v10 = vld [vmem:[%s2119_s10 + $0x8] sm:$0xff] }
 0x666   :  { %712 = vrot.lane.b32.xlu1 %v1926_v40, %s1782_s14 }
 0x6e2   :  { %v489_v12 = vpop.xlane.xlu1 %488 }
 0x6e3   :  { %1735 = vrcp.f32 %v489_v12  ;;  %v1208_v12 = vld [vmem:[%s2118_s9 + $0x10] sm:$0xff] }
 0x6e6   :  { %v713_v19 = vpop.permute.xlu1 %712 }
 0x6ed   :  { %v1736_v13 = vpop.eup %1735 }
 0x6ee   :  { %v491_v14 = vmul.f32 %v1736_v13, %v1734_v8  ;;  %v1283_v8 = vld [vmem:[%s2119_s10] sm:$0xff]  ;;  %v1209_v13 = vld [vmem:[%s2118_s9 + $0x18] sm:$0xff] }
 0x6ef   :  { %v1699_v11 = vpack.c.bf16 %v1284_v10, %v1283_v8 }
 0x6f0   :  { %1591 = vmatmul.mubr.msk.f32.vlgmr.msra.gmra.mrb[4].mxu1 %vm240_vm3, %v491_v14  ;;  %v1285_v14 = vld [vmem:[%s2119_s10 + $0x10] sm:$0xff] }
 0x6f1   :  { %1599 = vmatpush3.msra.mxu1 %v404_v15  ;;  %1600 = vmatprep.mubr.msk.f32.mxu1 %vm1776_vm1, %v1777_v9  ;;  %v1696_v15 = vpack.c.bf16 %v1209_v13, %v1208_v12 }
 0x6f2   :  { %1608 = vmatprep.subr.mxu1 %v1777_v9 }
 0x6f4   :  { %1601 = vmatmul.mubr.msk.f32.vlgmr.msra.gmra.mrb[6].mxu1 %vm240_vm3, %v400_v60 }
 0x6f5   :  { %1610 = vmatprep.mubr.msk.f32.mxu1 %vm1776_vm1, %v1777_v9 }
 0x7c3   :  { %v561_v16 = vpop.f32.mrb[4].mxu1 }
 0x7c4   :  { %v1592_v18 = vpop.f32.mrb[5].mxu1  ;;  %1596 = vmatmul.mubr.msk.f32.vlgmr.msra.gmra.mrb[6].mxu0 %vm240_vm3, %v561_v16  ;;  %v1286_v16 = vld [vmem:[%s2119_s10 + $0x18] sm:$0xff] }
 0x7c5   :  { %1604 = vmatpush3.xpose.msk.msra.mxu0 %vm240_vm3, %v715_v17  ;;  %1605 = vmatprep.mubr.msk.f32.mxu0 %vm1776_vm1, %v1777_v9 }
 0x7c6   :  { %1613 = vmatprep.subr.mxu0 %v1777_v9 }
 0x7c7   :  { %v708_v20 = vpop.f32.mrb[6].mxu1 }
 0x7c8   :  { %v1602_v21 = vpop.f32.mrb[7].mxu1  ;;  %1606 = vmatmul.mubr.msk.f32.vlgmr.msra.gmra.mrb[8].mxu0 %vm240_vm3, %v713_v19 }
 0x7c9   :  { %1615 = vmatprep.mubr.msk.f32.mxu0 %vm1776_vm1, %v1777_v9  ;;  %1614 = vmatpush3.msra.mxu0 %v879_v36 }
 0x7ca   :  { %1623 = vmatprep.subr.mxu0 %v1777_v9 }
 0x897   :  { %v635_v22 = vpop.f32.mrb[6].mxu0 }
 0x898   :  { %v709_v23 = vadd.f32 %v708_v20, %v635_v22  ;;  %v1597_v24 = vpop.f32.mrb[7].mxu0  ;;  %v1481_v22 = vld [vmem:[%s2111_s2] ss:$0 sm:$0xff] }
 0x89b   :  { %v786_v25 = vpop.f32.mrb[8].mxu0 }
 0x89c   :  { %v790_v26 = vmul.f32 0.35355338, %v786_v25  ;;  %v1607_v27 = vpop.f32.mrb[9].mxu0  ;;  %v1365_v25 = vld [vmem:[%s2120_s11] sm:$0xff] }
 0x89e   :  { %v791_v28 = vsel %vm236_vm4, %v790_v26, -1e+30  ;;  %v1366_v26 = vld [vmem:[%s2120_s11 + $0x8] sm:$0xff] }
 0x89f   :  { %v792_v29 = vsel %vm240_vm3, %v791_v28, -inf  ;;  %v1705_v27 = vpack.c.bf16 %v1366_v26, %v1365_v25 }
 0x8a0   :  { %793 = vmax.xlane.f32.xlu0 %v792_v29 }
 0x8b6   :  { %803 = vrot.lane.b32.xlu0 %v1926_v40, %s1783_s19 }
 0x92d   :  { %v794_v30 = vpop.xlane.xlu0 %793 }
 0x92e   :  { %v795_v31 = vsub.f32 %v791_v28, %v794_v30  ;;  %v1367_v28 = vld [vmem:[%s2120_s11 + $0x10] sm:$0xff]  ;;  %v1369_v30 = vld [vmem:[%s2120_s11 + $0x20] sm:$0xff] }
 0x930   :  { %v796_v32 = vmul.f32 1.442695, %v795_v31  ;;  %v1370_v31 = vld [vmem:[%s2120_s11 + $0x28] sm:$0xff] }
 0x931   :  { %v804_v33 = vpop.permute.xlu0 %803 }
 0x932   :  { %1737 = vpow2.f32 %v796_v32  ;;  %1609 = vmatpush3.msra.mxu1 %v804_v33  ;;  %v1711_v32 = vpack.c.bf16 %v1370_v31, %v1369_v30 }
 0x933   :  { %1618 = vmatprep.subr.mxu1 %v1777_v9 }
 0x93c   :  { %v1738_v34 = vpop.eup %1737 }
 0x93d   :  { %v798_v35 = vsel %vm240_vm3, %v1738_v34, 0.0 }
 0x93e   :  { %799 = vadd.xlane.f32.xlu1 %v798_v35 }
 0x94f   :  { %954 = vrot.lane.b32.xlu1 %v1926_v40, %s1784_s20 }
 0x9cb   :  { %v800_v37 = vpop.xlane.xlu1 %799 }
 0x9cc   :  { %1739 = vrcp.f32 %v800_v37 }
 0x9cf   :  { %v955_v40 = vpop.permute.xlu1 %954 }
 0x9d6   :  { %v1740_v38 = vpop.eup %1739 }
 0x9d7   :  { %v802_v39 = vmul.f32 %v1740_v38, %v1738_v34  ;;  %v1372_v34 = vld [vmem:[%s2120_s11 + $0x38] sm:$0xff] }
 0x9d9   :  { %1611 = vmatmul.mubr.msk.f32.vlgmr.msra.gmra.mrb[8].mxu1 %vm240_vm3, %v802_v39 }
 0x9da   :  { %1619 = vmatpush3.xpose.msk.msra.mxu1 %vm240_vm3, %v715_v17  ;;  %1620 = vmatprep.mubr.msk.f32.mxu1 %vm1776_vm1, %v1777_v9  ;;  %v1702_v17 = vpack.c.bf16 %v1286_v16, %v1285_v14 }
 0x9db   :  { %1628 = vmatprep.subr.mxu1 %v1777_v9 }
 0x9dd   :  { %1621 = vmatmul.mubr.msk.f32.vlgmr.msra.gmra.mrb[10].mxu1 %vm240_vm3, %v955_v40 }
 0x9de   :  { %1630 = vmatprep.mubr.msk.f32.mxu1 %vm1776_vm1, %v1777_v9  ;;  %1629 = vmatpush3.msra.mxu1 %v1114_v55 }
 0x9df   :  { %1698 = vmatprep.subr.bf16.mxu1 %v1775_v6 }
 0xaac   :  { %v875_v41 = vpop.f32.mrb[8].mxu1 }
 0xaad   :  { %v1612_v42 = vpop.f32.mrb[9].mxu1  ;;  %1616 = vmatmul.mubr.msk.f32.vlgmr.msra.gmra.mrb[10].mxu0 %vm240_vm3, %v875_v41 }
 0xaae   :  { %1624 = vmatpush3.msra.mxu0 %v804_v33  ;;  %1625 = vmatprep.mubr.msk.f32.mxu0 %vm1776_vm1, %v1777_v9  ;;  %v1371_v33 = vld [vmem:[%s2120_s11 + $0x30] sm:$0xff] }
 0xaaf   :  { %1692 = vmatprep.subr.bf16.mxu0 %v1775_v6  ;;  %v1714_v35 = vpack.c.bf16 %v1372_v34, %v1371_v33 }
 0xab0   :  { %v1024_v45 = vpop.f32.mrb[10].mxu1 }
 0xab1   :  { %v1028_v46 = vmul.f32 0.35355338, %v1024_v45  ;;  %v1622_v47 = vpop.f32.mrb[11].mxu1 }
 0xab3   :  { %v1029_v48 = vsel %vm236_vm4, %v1028_v46, -1e+30 }
 0xab4   :  { %v1030_v49 = vsel %vm240_vm3, %v1029_v48, -inf }
 0xab5   :  { %1031 = vmax.xlane.f32.xlu0 %v1030_v49 }
 0xb42   :  { %v1032_v50 = vpop.xlane.xlu0 %1031 }
 0xb43   :  { %v1033_v51 = vsub.f32 %v1029_v48, %v1032_v50 }
 0xb45   :  { %v1034_v52 = vmul.f32 1.442695, %v1033_v51 }
 0xb47   :  { %1741 = vpow2.f32 %v1034_v52 }
 0xb51   :  { %v1742_v53 = vpop.eup %1741 }
 0xb52   :  { %v1036_v54 = vsel %vm240_vm3, %v1742_v53, 0.0 }
 0xb53   :  { %1037 = vadd.xlane.f32.xlu1 %v1036_v54 }
 0xb80   :  { %v949_v43 = vpop.f32.mrb[10].mxu0 }
 0xb81   :  { %v953_v44 = vadd.f32 %v949_v43, %v709_v23  ;;  %v1617_v56 = vpop.f32.mrb[11].mxu0 }
 0xbe0   :  { %v1038_v57 = vpop.xlane.xlu1 %1037 }
 0xbe1   :  { %1743 = vrcp.f32 %v1038_v57 }
 0xbeb   :  { %v1744_v58 = vpop.eup %1743 }
 0xbec   :  { %v1040_v59 = vmul.f32 %v1744_v58, %v1742_v53 }
 0xbee   :  { %1626 = vmatmul.mubr.msk.f32.vlgmr.msra.gmra.mrb[12].mxu0 %vm240_vm3, %v1040_v59 }
 0xbef   :  { %1641 = vmatprep.mubr.msk.f32.mxu0 %vm1776_vm1, %v1777_v9 }
 0xcc1   :  { %v1110_v60 = vpop.f32.mrb[12].mxu0 }
 0xcc2   :  { %v1627_v61 = vpop.f32.mrb[13].mxu0  ;;  %1631 = vmatmul.mubr.msk.f32.vlgmr.msra.gmra.mrb[12].mxu1 %vm240_vm3, %v1110_v60 }
 0xcc3   :  { %1652 = vmatprep.mubr.msk.f32.mxu1 %vm1776_vm1, %v1777_v9  ;;  %1700 = vmatpush3.bf16.msra.mxu1 %v1699_v11 }
 0xcc4   :  { %1701 = vmatprep.subr.bf16.mxu1 %v1775_v6 }
 0xcc7   :  { %1703 = vmatpush3.bf16.msra.mxu1 %v1702_v17 }
 0xd95   :  { %v1184_v62 = vpop.f32.mrb[12].mxu1 }
 0xd96   :  { %v1188_v63 = vadd.f32 %v1184_v62, %v953_v44  ;;  %v1632_v1 = vpop.f32.mrb[13].mxu1 }
 0xd98   :  { %v2027_v2 = vadd.f32 %v1188_v63, %v1854_v0  ;;  %v1693_v0 = vpack.c.bf16 %v1207_v7, %v1206_v5 }
 0xd9a   :  { %v1191_v3 = vmul.f32 %v2027_v2, %v2027_v2  ;;  %1694 = vmatpush3.bf16.msra.mxu0 %v1693_v0 }
 0xd9b   :  { %1695 = vmatprep.subr.bf16.mxu0 %v1775_v6 }
 0xd9c   :  { %v1192_v4 = vsel %vm45_vm0, %v1191_v3, 0.0 }
 0xd9d   :  { %1193 = vadd.xlane.f32.xlu0 %v1192_v4 }
 0xd9e   :  { %1697 = vmatpush3.bf16.msra.mxu0 %v1696_v15 }
 0xd9f   :  { %1704 = vmatprep.subr.bf16.mxu0 %v1775_v6 }
 0xe2a   :  { %v1194_v18 = vpop.xlane.xlu0 %1193 }
 0xe2b   :  { %v1195_v19 = vmul.f32 0.03125, %v1194_v18 }
 0xe2d   :  { %v1196_v20 = vadd.f32 1e-05, %v1195_v19 }
 0xe2f   :  { %1745 = vrsqrt.f32 %v1196_v20 }
 0xe39   :  { %v1746_v21 = vpop.eup %1745 }
 0xe3a   :  { %v1198_v23 = vmul.f32 %v1746_v21, %v2027_v2 }
 0xe3c   :  { %v1205_v24 = vmul.f32 %v1481_v22, %v1198_v23 }
 0xe3e   :  { %1642 = vmatmul.mubr.msk.f32.vlgmr.msra.gmra.mrb[14].mxu0 %vm45_vm0, %v1205_v24  ;;  %1653 = vmatmul.mubr.msk.f32.vlgmr.msra.gmra.mrb[14].mxu1 %vm45_vm0, %v1205_v24 }
 0xe3f   :  { %1671 = vmatprep.mubr.msk.f32.mxu0 %vm1776_vm1, %v1777_v9  ;;  %1706 = vmatpush3.bf16.msra.mxu0 %v1705_v27  ;;  %v1368_v9 = vld [vmem:[%s2120_s11 + $0x18] sm:$0xff]  ;;  %s1751_s11 = scalar_lea.vmem %s1454_s0, 128 }
 0xe40   :  { %1707 = vmatprep.subr.bf16.mxu0 %v1775_v6  ;;  %v1708_v29 = vpack.c.bf16 %v1368_v9, %v1367_v28  ;;  %p1752_p0 = scmp.ne.s32.totalorder %s1454_s0, %s1751_s11  ;;  %p1757_p2 = scmp.lt.s32.totalorder %s1751_s11, %s1751_s11 }
 0xe42   :  { %p1758_p3 = por %p1757_p2, %p1756_p1 }
 0xe43   :  { %1709 = vmatpush3.bf16.msra.mxu0 %v1708_v29 }
 0xe44   :  { %1710 = vmatprep.subr.bf16.mxu0 %v1775_v6  ;;  %p1759_p4 = pnand %p1758_p3, %p1752_p0 }
 0xe47   :  { %1712 = vmatpush3.bf16.msra.mxu0 %v1711_v32 }
 0xe48   :  { %1713 = vmatprep.subr.bf16.mxu0 %v1775_v6 }
 0xe4b   :  { %1715 = vmatpush3.bf16.msra.mxu0 %v1714_v35 }
 0xf11   :  { %v1279_v36 = vpop.f32.mrb[14].mxu0  ;;  %v1353_v37 = vpop.f32.mrb[14].mxu1 }
 0xf12   :  { %v1484_v38 = vmul.f32 -1.442695, %v1279_v36  ;;  %v1643_v39 = vpop.f32.mrb[15].mxu0  ;;  %v1654_v40 = vpop.f32.mrb[15].mxu1 }
 0xf14   :  { %1747 = vpow2.f32 %v1484_v38 }
 0xf1e   :  { %v1748_v41 = vpop.eup %1747 }
 0xf1f   :  { %v1360_v42 = vadd.f32 1.0, %v1748_v41 }
 0xf21   :  { %1749 = vrcp.f32 %v1360_v42 }
 0xf2b   :  { %v1750_v6 = vpop.eup %1749 }
 0xf2c   :  { %v1363_v45 = vmul.f32 %v1750_v6, %v1279_v36 }
 0xf2e   :  { %v1364_v46 = vmul.f32 %v1363_v45, %v1353_v37 }
 0xf30   :  { %1672 = vmatmul.mubr.msk.f32.vlgmr.msra.gmra.mrb[16].mxu0 %vm153_vm2, %v1364_v46 }
0x1003   :  { %v1442_v47 = vpop.f32.mrb[16].mxu0 }
0x1004   :  { %v1443_v48 = vadd.f32 %v1442_v47, %v2027_v2  ;;  %v1673_v49 = vpop.f32.mrb[17].mxu0 }
0x1006   :  { %1446 = vst.msk [vmem:[#allocation2] sm:$0xff] %vm45_vm0, %v1443_v48 }
0x1007   :  { %1762 = shalt.err (!%p1759_p4)
}
0x1008   :  { %s1763_s7 = scalar_lea.hbm %s2121_s12, 128 }
0x1009   :  { %p1764_p5 = scmp.ne.s32.totalorder %s2121_s12, %s1763_s7  ;;  %p1767_p6 = scmp.lt.u32.totalorder %s1763_s7, %s2121_s12 }
0x100b   :  { %p1769_p7 = pnand %p1767_p6, %p1764_p5 }
0x100d   :  { %1772 = shalt.err (!%p1769_p7)
}
0x100e   :  { %1456 = dma.vmem_to_hbm [thread:$0]  %s1454_s0, 128, %s2121_s12, [#allocation3]  }
0x100f   :  { %1773 = dma.done.wait [#allocation3], 128  }
0x1010   :  { %1774 = vsyncadd [#allocation3], 4294967168 }
0x1011   :  { %1460 = vsyncpa [#allocation3], 1 }

</bundles_post_ra>
